<compile_context>
chip_gen: v6e
topology: v6e:2x2x1
jax: 0.10.0
libtpu: 0.0.40
codegen_flags: <defaults>
</compile_context>

<pallas_src>
import jax
import jax.numpy as jnp
from jax.experimental import pallas as pl
from jax.experimental.pallas import tpu as pltpu


def _round_up(x, m):
    return ((x + m - 1) // m) * m


def _cdiv(a, b):
    return -(-a // b)


def _choose_tiles(B, tb):
    """Pick a batch tile TB and padded batch Bp.

    TB is either the full (8-rounded) batch (single grid step, block == full
    array, so any width is legal) or a multiple of 128 so the lane-dense
    (1, TB) output block satisfies the (8, 128) rule across multiple steps.
    At least 2 grid steps are produced whenever the batch allows, so both
    TensorCores on v7x get work.
    """
    Bp8 = _round_up(B, 8)
    tb = max(128, _round_up(tb, 128))
    if Bp8 <= 128:
        return Bp8, Bp8                          # single tiny tile
    TB = min(tb, 128 * _cdiv(_cdiv(Bp8, 2), 128))  # >= 2 steps, 128-aligned
    Bp = TB * _cdiv(B, TB)
    return TB, Bp


# ----------------------------------------------------------------------------
# Kernel
# ----------------------------------------------------------------------------
def critic_kernel(xs_ref,    # (TB, in+out)   streamed [state | action], bf16
                  wf_ref,    # (in+out, fc1+fc2) block-diag [w1 0; 0 wa], bf16
                  bf_ref,    # (1, fc1+fc2)   [b1 | ba], f32
                  ln1_ref,   # (2, fc1)       [gamma1; beta1], f32
                  w2_ref,    # (fc1, fc2)     bf16
                  p2_ref,    # (4, fc2)       [b2; gamma2; beta2; wq], f32
                  bq_ref,    # (1, 1)         f32
                  out_ref):  # (1, TB)        f32, lane-dense
    eps = 1e-5
    fc1 = ln1_ref.shape[1]

    # ---- fused fc1 + action_value matmul (bf16 MXU, f32 accumulate) --------
    h = jnp.dot(xs_ref[...].astype(wf_ref.dtype), wf_ref[...],
                preferred_element_type=jnp.float32) + bf_ref[...]
    q = h[:, :fc1]                                  # fc1(state) + b1
    av = jnp.tanh(h[:, fc1:])                       # tanh(action_value(action) + ba)

    # ---- LayerNorm(fc1) + tanh (all f32) ------------------------------------
    mu = jnp.mean(q, axis=-1, keepdims=True)
    d = q - mu
    var = jnp.mean(d * d, axis=-1, keepdims=True)
    q = jnp.tanh(d * jax.lax.rsqrt(var + eps) * ln1_ref[0:1, :] + ln1_ref[1:2, :])

    # ---- fc2 + LayerNorm + tanh ---------------------------------------------
    q = jnp.dot(q.astype(w2_ref.dtype), w2_ref[...],
                preferred_element_type=jnp.float32) + p2_ref[0:1, :]
    mu = jnp.mean(q, axis=-1, keepdims=True)
    d = q - mu
    var = jnp.mean(d * d, axis=-1, keepdims=True)
    q = jnp.tanh(d * jax.lax.rsqrt(var + eps) * p2_ref[1:2, :] + p2_ref[2:3, :])

    # ---- q head on the MXU, lane-dense: (1,fc2) x (TB,fc2)^T -> (1, TB) -----
    s = q + av
    head = jax.lax.dot_general(
        p2_ref[3:4, :], s,
        dimension_numbers=(((1,), (1,)), ((), ())),
        preferred_element_type=jnp.float32)
    out_ref[...] = (head + bq_ref[...]).astype(out_ref.dtype)


# ----------------------------------------------------------------------------
# Wrapper
# ----------------------------------------------------------------------------
def prepare_kernel_params(params, mm_dtype=jnp.bfloat16):
    """One-time packing/casting of the torch-like params for the kernel."""
    w1, wa = params["w1"], params["wa"]
    in_dims, fc1 = w1.shape
    out_dims, fc2 = wa.shape
    f32 = lambda x: jnp.asarray(x, jnp.float32)

    # block-diagonal fused weight: [state|action] @ wf == [state@w1 | action@wa]
    wf = jnp.zeros((in_dims + out_dims, fc1 + fc2), jnp.float32)
    wf = wf.at[:in_dims, :fc1].set(f32(w1))
    wf = wf.at[in_dims:, fc1:].set(f32(wa))

    return {
        "wf": wf.astype(mm_dtype),
        "bf": jnp.concatenate([f32(params["b1"]).reshape(1, fc1),
                               f32(params["ba"]).reshape(1, fc2)], axis=1),
        "ln1": jnp.concatenate([f32(params["g1"]).reshape(1, fc1),
                                f32(params["beta1"]).reshape(1, fc1)], axis=0),
        "w2": f32(params["w2"]).astype(mm_dtype),
        "p2": jnp.concatenate([f32(params["b2"]).reshape(1, fc2),
                               f32(params["g2"]).reshape(1, fc2),
                               f32(params["beta2"]).reshape(1, fc2),
                               f32(params["wq"]).reshape(1, fc2)], axis=0),
        "bq": f32(params["bq"]).reshape(1, 1),
        "dims": (in_dims, out_dims, fc1, fc2),
    }


def critic_forward(state, action, kparams, *, tb=1024):
    """state: (B, in_dims), action: (B, out_dims) -> (B, 1) float32."""
    B = state.shape[0]
    in_dims, out_dims, fc1, fc2 = kparams["dims"]
    K = in_dims + out_dims

    TB, Bp = _choose_tiles(B, tb)

    # One streamed operand: [state | action]; cast to the MXU dtype on the same
    # pass as the concatenation (no extra HBM pass, half the streamed bytes).
    xs = jnp.concatenate([state, action], axis=-1).astype(kparams["wf"].dtype)
    if Bp != B:
        xs = jnp.pad(xs, ((0, Bp - B), (0, 0)))

    # Resident (constant-index) spec for packed weights / biases / LN params.
    def resident(shape):
        return pl.BlockSpec(shape, lambda i: (0, 0))

    in_specs = [
        pl.BlockSpec((TB, K), lambda i: (i, 0)),      # [state | action] tile
        resident((K, fc1 + fc2)),                     # fused block-diag weight
        resident((1, fc1 + fc2)),                     # [b1 | ba]
        resident((2, fc1)),                           # [gamma1; beta1]
        resident((fc1, fc2)),                         # w2
        resident((4, fc2)),                           # [b2; gamma2; beta2; wq]
        resident((1, 1)),                             # bq
    ]
    out_specs = pl.BlockSpec((1, TB), lambda i: (0, i))   # lane-dense output

    grid = (Bp // TB,)

    # Advisory cost estimate (fused matmul + fc2 + head; tanh/rsqrt on EUP).
    flops = 2 * Bp * (K * (fc1 + fc2) + fc1 * fc2 + fc2)
    transc = Bp * (fc1 + 2 * fc2 + 2)
    bytes_accessed = (
        Bp * K * 2 + Bp * 4
        + (K * (fc1 + fc2) + fc1 * fc2) * 2
        + ((fc1 + fc2) + 2 * fc1 + 4 * fc2 + 1) * 4
    )

    out = pl.pallas_call(
        critic_kernel,
        out_shape=jax.ShapeDtypeStruct((1, Bp), jnp.float32),
        grid=grid,
        in_specs=in_specs,
        out_specs=out_specs,
        compiler_params=pltpu.CompilerParams(
            dimension_semantics=("parallel",),
            vmem_limit_bytes=32 * 1024 * 1024,
        ),
        cost_estimate=pl.CostEstimate(
            flops=int(flops),
            transcendentals=int(transc),
            bytes_accessed=int(bytes_accessed),
        ),
    )(xs, kparams["wf"], kparams["bf"], kparams["ln1"],
      kparams["w2"], kparams["p2"], kparams["bq"])

    return out.reshape(Bp, 1)[:B]


# ----------------------------------------------------------------------------
# Reference + init (torch-Linear-like)
# ----------------------------------------------------------------------------
def init_params(key, in_dims, fc1_dims, fc2_dims, out_dims):
    """Deterministic, torch-Linear-like init (uniform +-1/sqrt(fan_in))."""
    ks = jax.random.split(key, 8)

    def linear(kw, kb, fan_in, fan_out):
        bound = 1.0 / jnp.sqrt(fan_in)
        w = jax.random.uniform(kw, (fan_in, fan_out), jnp.float32, -bound, bound)
        b = jax.random.uniform(kb, (1, fan_out), jnp.float32, -bound, bound)
        return w, b

    w1, b1 = linear(ks[0], ks[1], in_dims, fc1_dims)
    w2, b2 = linear(ks[2], ks[3], fc1_dims, fc2_dims)
    wa, ba = linear(ks[4], ks[5], out_dims, fc2_dims)
    wq, bq = linear(ks[6], ks[7], fc2_dims, 1)

    return {
        "w1": w1, "b1": b1,
        "g1": jnp.ones((1, fc1_dims), jnp.float32),
        "beta1": jnp.zeros((1, fc1_dims), jnp.float32),
        "w2": w2, "b2": b2,
        "g2": jnp.ones((1, fc2_dims), jnp.float32),
        "beta2": jnp.zeros((1, fc2_dims), jnp.float32),
        "wa": wa, "ba": ba,
        "wq": wq, "bq": bq,
    }


def critic_ref(state, action, p):
    """Pure-JAX float32 reference for sanity checking."""
    eps = 1e-5

    def ln(x, g, b):
        mu = jnp.mean(x, axis=-1, keepdims=True)
        var = jnp.mean((x - mu) ** 2, axis=-1, keepdims=True)
        return (x - mu) * jax.lax.rsqrt(var + eps) * g + b

    q = jnp.tanh(ln(state @ p["w1"] + p["b1"], p["g1"], p["beta1"]))
    q = jnp.tanh(ln(q @ p["w2"] + p["b2"], p["g2"], p["beta2"]))
    av = jnp.tanh(action @ p["wa"] + p["ba"])
    return (q + av) @ p["wq"] + p["bq"]


if __name__ == "__main__":
    # state: (B, in_dims), action: (B, out_dims)
    B, in_dims, fc1_dims, fc2_dims, out_dims = 8, 32, 64, 64, 8

    key = jax.random.PRNGKey(0)
    k_state, k_action, k_params = jax.random.split(key, 3)

    state = jax.random.normal(k_state, (B, in_dims), jnp.float32)
    action = jax.random.normal(k_action, (B, out_dims), jnp.float32)
    params = init_params(k_params, in_dims, fc1_dims, fc2_dims, out_dims)
    kparams = prepare_kernel_params(params)      # one-time pack / bf16 cast

    out = jax.block_until_ready(critic_forward(state, action, kparams))
    ref = critic_ref(state, action, params)
    assert out.shape == (B, 1), out.shape
    # bf16 matmul operands -> compare to the f32 reference with a loose tol.
    assert jnp.allclose(out, ref, atol=5e-2, rtol=5e-2), (out, ref)

    # Second case: multi-step grid, resident weights, batch padding, lane-dense
    # output across several (1, TB) blocks.
    B2 = 300
    k_s2, k_a2 = jax.random.split(jax.random.PRNGKey(1), 2)
    state2 = jax.random.normal(k_s2, (B2, in_dims), jnp.float32)
    action2 = jax.random.normal(k_a2, (B2, out_dims), jnp.float32)
    out2 = jax.block_until_ready(critic_forward(state2, action2, kparams, tb=128))
    ref2 = critic_ref(state2, action2, params)
    assert out2.shape == (B2, 1), out2.shape
    assert jnp.allclose(out2, ref2, atol=5e-2, rtol=5e-2)

    print("KERNEL_OK")
</pallas_src>

<mosaic_0001>
module attributes {stable_mosaic.version = 11 : i64} {
  func.func @critic_kernel(%arg0: i32, %arg1: memref<8x40xbf16, #tpu.memory_space<vmem>>, %arg2: memref<40x128xbf16, #tpu.memory_space<vmem>>, %arg3: memref<1x128xf32, #tpu.memory_space<vmem>>, %arg4: memref<2x64xf32, #tpu.memory_space<vmem>>, %arg5: memref<64x64xbf16, #tpu.memory_space<vmem>>, %arg6: memref<4x64xf32, #tpu.memory_space<vmem>>, %arg7: memref<1x1xf32, #tpu.memory_space<vmem>>, %arg8: memref<1x8xf32, #tpu.memory_space<vmem>>) attributes {dimension_semantics = [#tpu.dimension_semantics<parallel>], iteration_bounds = array<i64: 1>, scalar_prefetch = 0 : i64, scratch_operands = 0 : i64, tpu.core_type = #tpu.core_type<tc>, window_params = [{transform_indices = @transform_0, window_bounds = array<i64: 8, 40>}, {pipeline_mode = #tpu.pipeline_mode<synchronous>, transform_indices = @transform_1, window_bounds = array<i64: 40, 128>}, {pipeline_mode = #tpu.pipeline_mode<synchronous>, transform_indices = @transform_2, window_bounds = array<i64: 1, 128>}, {pipeline_mode = #tpu.pipeline_mode<synchronous>, transform_indices = @transform_3, window_bounds = array<i64: 2, 64>}, {pipeline_mode = #tpu.pipeline_mode<synchronous>, transform_indices = @transform_4, window_bounds = array<i64: 64, 64>}, {pipeline_mode = #tpu.pipeline_mode<synchronous>, transform_indices = @transform_5, window_bounds = array<i64: 4, 64>}, {pipeline_mode = #tpu.pipeline_mode<synchronous>, transform_indices = @transform_6, window_bounds = array<i64: 1, 1>}, {transform_indices = @transform_7, window_bounds = array<i64: 1, 8>}]} {
    %c0 = arith.constant 0 : index
    %c0_0 = arith.constant 0 : index
    %0 = vector.load %arg1[%c0, %c0_0] : memref<8x40xbf16, #tpu.memory_space<vmem>>, vector<8x40xbf16>
    %c0_1 = arith.constant 0 : index
    %c0_2 = arith.constant 0 : index
    %1 = vector.load %arg2[%c0_1, %c0_2] : memref<40x128xbf16, #tpu.memory_space<vmem>>, vector<40x128xbf16>
    %cst = arith.constant dense<0.000000e+00> : vector<8x128xf32>
    %2 = tpu.matmul %0, %1, %cst {dimension_numbers = #tpu.dot_dimension_numbers<[1], [0], [0], [1], [0, 0, 1, 1], [], []>} : vector<8x40xbf16>, vector<40x128xbf16>, vector<8x128xf32> -> vector<8x128xf32>
    %c0_3 = arith.constant 0 : index
    %c0_4 = arith.constant 0 : index
    %3 = vector.load %arg3[%c0_3, %c0_4] : memref<1x128xf32, #tpu.memory_space<vmem>>, vector<1x128xf32>
    %4 = vector.broadcast %3 : vector<1x128xf32> to vector<8x128xf32>
    %5 = arith.addf %2, %4 : vector<8x128xf32>
    %6 = vector.extract_strided_slice %5 {offsets = [0, 0], sizes = [8, 64], strides = [1, 1]} : vector<8x128xf32> to vector<8x64xf32>
    %7 = vector.extract_strided_slice %5 {offsets = [0, 64], sizes = [8, 64], strides = [1, 1]} : vector<8x128xf32> to vector<8x64xf32>
    %8 = math.tanh %7 : vector<8x64xf32>
    %cst_5 = arith.constant dense<0.000000e+00> : vector<8xf32>
    %9 = vector.multi_reduction <add>, %6, %cst_5 [1] : vector<8x64xf32> to vector<8xf32>
    %10 = vector.shape_cast %9 : vector<8xf32> to vector<8x1xf32>
    %cst_6 = arith.constant 6.400000e+01 : f32
    %11 = vector.broadcast %cst_6 : f32 to vector<8x1xf32>
    %12 = arith.divf %10, %11 : vector<8x1xf32>
    %13 = vector.broadcast %12 : vector<8x1xf32> to vector<8x64xf32>
    %14 = arith.subf %6, %13 : vector<8x64xf32>
    %15 = arith.mulf %14, %14 : vector<8x64xf32>
    %cst_7 = arith.constant dense<0.000000e+00> : vector<8xf32>
    %16 = vector.multi_reduction <add>, %15, %cst_7 [1] : vector<8x64xf32> to vector<8xf32>
    %17 = vector.shape_cast %16 : vector<8xf32> to vector<8x1xf32>
    %cst_8 = arith.constant 6.400000e+01 : f32
    %18 = vector.broadcast %cst_8 : f32 to vector<8x1xf32>
    %19 = arith.divf %17, %18 : vector<8x1xf32>
    %cst_9 = arith.constant 9.99999974E-6 : f32
    %20 = vector.broadcast %cst_9 : f32 to vector<8x1xf32>
    %21 = arith.addf %19, %20 : vector<8x1xf32>
    %22 = math.rsqrt %21 : vector<8x1xf32>
    %23 = vector.broadcast %22 : vector<8x1xf32> to vector<8x64xf32>
    %24 = arith.mulf %14, %23 : vector<8x64xf32>
    %c0_10 = arith.constant 0 : index
    %c0_11 = arith.constant 0 : index
    %25 = vector.load %arg4[%c0_10, %c0_11] : memref<2x64xf32, #tpu.memory_space<vmem>>, vector<1x64xf32>
    %26 = vector.broadcast %25 : vector<1x64xf32> to vector<8x64xf32>
    %27 = arith.mulf %24, %26 : vector<8x64xf32>
    %c1 = arith.constant 1 : index
    %c0_12 = arith.constant 0 : index
    %28 = vector.load %arg4[%c1, %c0_12] : memref<2x64xf32, #tpu.memory_space<vmem>>, vector<1x64xf32>
    %29 = vector.broadcast %28 : vector<1x64xf32> to vector<8x64xf32>
    %30 = arith.addf %27, %29 : vector<8x64xf32>
    %31 = math.tanh %30 : vector<8x64xf32>
    %32 = arith.truncf %31 : vector<8x64xf32> to vector<8x64xbf16>
    %c0_13 = arith.constant 0 : index
    %c0_14 = arith.constant 0 : index
    %33 = vector.load %arg5[%c0_13, %c0_14] : memref<64x64xbf16, #tpu.memory_space<vmem>>, vector<64x64xbf16>
    %cst_15 = arith.constant dense<0.000000e+00> : vector<8x64xf32>
    %34 = tpu.matmul %32, %33, %cst_15 {dimension_numbers = #tpu.dot_dimension_numbers<[1], [0], [0], [1], [0, 0, 1, 1], [], []>} : vector<8x64xbf16>, vector<64x64xbf16>, vector<8x64xf32> -> vector<8x64xf32>
    %c0_16 = arith.constant 0 : index
    %c0_17 = arith.constant 0 : index
    %35 = vector.load %arg6[%c0_16, %c0_17] : memref<4x64xf32, #tpu.memory_space<vmem>>, vector<1x64xf32>
    %36 = vector.broadcast %35 : vector<1x64xf32> to vector<8x64xf32>
    %37 = arith.addf %34, %36 : vector<8x64xf32>
    %cst_18 = arith.constant dense<0.000000e+00> : vector<8xf32>
    %38 = vector.multi_reduction <add>, %37, %cst_18 [1] : vector<8x64xf32> to vector<8xf32>
    %39 = vector.shape_cast %38 : vector<8xf32> to vector<8x1xf32>
    %cst_19 = arith.constant 6.400000e+01 : f32
    %40 = vector.broadcast %cst_19 : f32 to vector<8x1xf32>
    %41 = arith.divf %39, %40 : vector<8x1xf32>
    %42 = vector.broadcast %41 : vector<8x1xf32> to vector<8x64xf32>
    %43 = arith.subf %37, %42 : vector<8x64xf32>
    %44 = arith.mulf %43, %43 : vector<8x64xf32>
    %cst_20 = arith.constant dense<0.000000e+00> : vector<8xf32>
    %45 = vector.multi_reduction <add>, %44, %cst_20 [1] : vector<8x64xf32> to vector<8xf32>
    %46 = vector.shape_cast %45 : vector<8xf32> to vector<8x1xf32>
    %cst_21 = arith.constant 6.400000e+01 : f32
    %47 = vector.broadcast %cst_21 : f32 to vector<8x1xf32>
    %48 = arith.divf %46, %47 : vector<8x1xf32>
    %cst_22 = arith.constant 9.99999974E-6 : f32
    %49 = vector.broadcast %cst_22 : f32 to vector<8x1xf32>
    %50 = arith.addf %48, %49 : vector<8x1xf32>
    %51 = math.rsqrt %50 : vector<8x1xf32>
    %52 = vector.broadcast %51 : vector<8x1xf32> to vector<8x64xf32>
    %53 = arith.mulf %43, %52 : vector<8x64xf32>
    %c1_23 = arith.constant 1 : index
    %c0_24 = arith.constant 0 : index
    %54 = vector.load %arg6[%c1_23, %c0_24] : memref<4x64xf32, #tpu.memory_space<vmem>>, vector<1x64xf32>
    %55 = vector.broadcast %54 : vector<1x64xf32> to vector<8x64xf32>
    %56 = arith.mulf %53, %55 : vector<8x64xf32>
    %c2 = arith.constant 2 : index
    %c0_25 = arith.constant 0 : index
    %57 = vector.load %arg6[%c2, %c0_25] : memref<4x64xf32, #tpu.memory_space<vmem>>, vector<1x64xf32>
    %58 = vector.broadcast %57 : vector<1x64xf32> to vector<8x64xf32>
    %59 = arith.addf %56, %58 : vector<8x64xf32>
    %60 = math.tanh %59 : vector<8x64xf32>
    %61 = arith.addf %60, %8 : vector<8x64xf32>
    %c3 = arith.constant 3 : index
    %c0_26 = arith.constant 0 : index
    %62 = vector.load %arg6[%c3, %c0_26] : memref<4x64xf32, #tpu.memory_space<vmem>>, vector<1x64xf32>
    %cst_27 = arith.constant dense<0.000000e+00> : vector<1x8xf32>
    %63 = tpu.matmul %62, %61, %cst_27 {dimension_numbers = #tpu.dot_dimension_numbers<[1], [1], [0], [0], [0, 0, 1, 0], [], []>} : vector<1x64xf32>, vector<8x64xf32>, vector<1x8xf32> -> vector<1x8xf32>
    %c0_28 = arith.constant 0 : index
    %c0_29 = arith.constant 0 : index
    %64 = vector.load %arg7[%c0_28, %c0_29] : memref<1x1xf32, #tpu.memory_space<vmem>>, vector<1x1xf32>
    %65 = vector.broadcast %64 : vector<1x1xf32> to vector<1x8xf32>
    %66 = arith.addf %63, %65 : vector<1x8xf32>
    %c0_30 = arith.constant 0 : index
    %c0_31 = arith.constant 0 : index
    %67 = vector.load %arg8[%c0_30, %c0_31] : memref<1x8xf32, #tpu.memory_space<vmem>>, vector<1x8xf32>
    tpu.vector_store %arg8[%c0_30, %c0_31], %66 {strides = array<i32>} : memref<1x8xf32, #tpu.memory_space<vmem>>, vector<1x8xf32>,
    return
  }
  func.func @transform_0(%arg0: i32) -> (i32, i32) {
    %c0_i32 = arith.constant 0 : i32
    %c0_i32_0 = arith.constant 0 : i32
    return %arg0, %c0_i32 : i32, i32
  }
  func.func @transform_1(%arg0: i32) -> (i32, i32) {
    %c0_i32 = arith.constant 0 : i32
    %c0_i32_0 = arith.constant 0 : i32
    %c0_i32_1 = arith.constant 0 : i32
    return %c0_i32, %c0_i32_0 : i32, i32
  }
  func.func @transform_2(%arg0: i32) -> (i32, i32) {
    %c0_i32 = arith.constant 0 : i32
    %c0_i32_0 = arith.constant 0 : i32
    %c0_i32_1 = arith.constant 0 : i32
    return %c0_i32, %c0_i32_0 : i32, i32
  }
  func.func @transform_3(%arg0: i32) -> (i32, i32) {
    %c0_i32 = arith.constant 0 : i32
    %c0_i32_0 = arith.constant 0 : i32
    %c0_i32_1 = arith.constant 0 : i32
    return %c0_i32, %c0_i32_0 : i32, i32
  }
  func.func @transform_4(%arg0: i32) -> (i32, i32) {
    %c0_i32 = arith.constant 0 : i32
    %c0_i32_0 = arith.constant 0 : i32
    %c0_i32_1 = arith.constant 0 : i32
    return %c0_i32, %c0_i32_0 : i32, i32
  }
  func.func @transform_5(%arg0: i32) -> (i32, i32) {
    %c0_i32 = arith.constant 0 : i32
    %c0_i32_0 = arith.constant 0 : i32
    %c0_i32_1 = arith.constant 0 : i32
    return %c0_i32, %c0_i32_0 : i32, i32
  }
  func.func @transform_6(%arg0: i32) -> (i32, i32) {
    %c0_i32 = arith.constant 0 : i32
    %c0_i32_0 = arith.constant 0 : i32
    %c0_i32_1 = arith.constant 0 : i32
    return %c0_i32, %c0_i32_0 : i32, i32
  }
  func.func @transform_7(%arg0: i32) -> (i32, i32) {
    %c0_i32 = arith.constant 0 : i32
    %c0_i32_0 = arith.constant 0 : i32
    return %c0_i32, %arg0 : i32, i32
  }
}

</mosaic_0001>

<bundles_post_ra>
// kernel: tpu_custom_call.1
= control target key start
LH: loop header
LB: loop body
LE: loop exit
PB: predicated region body
PF: predicated region fallthrough
CT: control target
= control target key end

     0   :  { %s660_s0 = inlined_call_operand.hbm [shape: bf16[8,40], index: 0, kind: input, shape index: {}]   ;;  %s661_s1 = inlined_call_operand.hbm [shape: bf16[40,128], index: 1, kind: input, shape index: {}]   ;;  %s662_s2 = inlined_call_operand.vmem [shape: f32[1,128], index: 2, kind: input, shape index: {}]   ;;  %s663_s3 = inlined_call_operand.vmem [shape: f32[2,64], index: 3, kind: input, shape index: {}]   ;;  %s664_s4 = inlined_call_operand.hbm [shape: bf16[64,64], index: 4, kind: input, shape index: {}]   ;;  %s665_s5 = inlined_call_operand.vmem [shape: f32[4,64], index: 5, kind: input, shape index: {}]   ;;  %s666_s6 = inlined_call_operand.<no memory space> [shape: f32[1,1], index: 6, kind: input, shape index: {}]   ;;  %s667_s7 = inlined_call_operand.hbm [shape: f32[1,8], index: 7, kind: output, shape index: {}]  }
   0x1   :  { %v12_v0 = vstv %s666_s6 }
   0x2   :  { %13 = vst [vmem:[#allocation2] sm:$0x1] %v12_v0 }
   0x3   :  { %14 = vsyncpa [#allocation4], 0 }
   0x4   :  { %15 = vsyncpa [#allocation7], 0 }
   0x5   :  { %16 = vsyncpa [#allocation5], 0  ;;  %s560_s26 = smov [#allocation6]  }
   0x6   :  { %s32_s27 = sshll.u32 %s560_s26, 4  ;;  %s33_s27 = int_to_ptr.vmem [resolvable:$true] %s32_s27 }
   0x7   :  { %s482_s28 = scalar_lea.vmem %s33_s27, 320  ;;  %p487_p1 = scmp.lt.s32.totalorder %s33_s27, %s33_s27 }
   0x8   :  { %p483_p0 = scmp.ne.s32.totalorder %s33_s27, %s482_s28  ;;  %p488_p2 = scmp.lt.s32.totalorder %s482_s28, %s482_s28 }
   0xa   :  { %p489_p3 = por %p488_p2, %p487_p1 }
   0xc   :  { %p490_p4 = pnand %p489_p3, %p483_p0 }
   0xe   :  { %493 = shalt.err (!%p490_p4)
}
   0xf   :  { %s561_s29 = smov 64   ;;  %s562_s30 = smov 4  }
  0x10   :  { %38 = dma.hbm_to_vmem [thread:$0]  %s661_s1, 320, %s33_s27, [#allocation7], %s561_s29, %s561_s29, %s562_s30  }
  0x11   :  { %s563_s9 = smov [#allocation3]   ;;  %s564_s11 = smov [#allocation8]  }
  0x12   :  { %s23_s10 = sshll.u32 %s563_s9, 4  ;;  %s48_s12 = sshll.u32 %s564_s11, 4  ;;  %s24_s10 = int_to_ptr.vmem [resolvable:$true] %s23_s10  ;;  %s49_s12 = int_to_ptr.vmem [resolvable:$true] %s48_s12 }
  0x13   :  { %s502_s13 = scalar_lea.vmem %s24_s10, 64  ;;  %p507_p6 = scmp.lt.s32.totalorder %s24_s10, %s24_s10 }
  0x14   :  { %p503_p5 = scmp.ne.s32.totalorder %s24_s10, %s502_s13  ;;  %p508_p7 = scmp.lt.s32.totalorder %s502_s13, %s502_s13 }
  0x16   :  { %p509_p8 = por %p508_p7, %p507_p6 }
  0x18   :  { %p510_p9 = pnand %p509_p8, %p503_p5 }
  0x1a   :  { %513 = shalt.err (!%p510_p9)
}
  0x1b   :  { %26 = dma.hbm_to_vmem [thread:$0]  %s660_s0, 64, %s24_s10, [#allocation4]  }
  0x1c   :  { %s522_s16 = scalar_lea.vmem %s49_s12, 512  ;;  %p527_p11 = scmp.lt.s32.totalorder %s49_s12, %s49_s12 }
  0x1d   :  { %p523_p10 = scmp.ne.s32.totalorder %s49_s12, %s522_s16  ;;  %p528_p12 = scmp.lt.s32.totalorder %s522_s16, %s522_s16 }
  0x1f   :  { %p529_p13 = por %p528_p12, %p527_p11 }
  0x21   :  { %p530_p0 = pnand %p529_p13, %p523_p10 }
  0x23   :  { %533 = shalt.err (!%p530_p0)
}
  0x24   :  { %54 = dma.hbm_to_vmem [thread:$0]  %s664_s4, 512, %s49_s12, [#allocation7], %s561_s29, %s561_s29, %s562_s30  }
  0x25   :  { %554 = dma.done.wait [#allocation4], 64  }
  0x26   :  { %555 = vsyncadd [#allocation4], 4294967232 }
  0x27   :  { %556 = dma.done.wait [#allocation7], 832  }
  0x28   :  { %557 = vsyncadd [#allocation7], 4294966464  ;;  %v565_v1 = vmov 0.0   ;;  %vm566_vm0 = vmmov 0   ;;  %vm101_vm1 = vcmask 1043456   ;;  %v458_v4 = vld [vmem:[#allocation6 + $0x8] sm:$0xff]   ;;  %v293_v62 = vlaneseq }
  0x29   :  { %419 = vmatprep.subr.bf16.mxu0 %v565_v1  ;;  %425 = vmatprep.mubr.msk.bf16.mxu0 %vm566_vm0, %v565_v1  ;;  %v457_v2 = vld [vmem:[#allocation6 + $0x10] ss:$0 sps:$4 sm:$0xff]   ;;  %v459_v5 = vld [vmem:[#allocation6] sm:$0xff]   ;;  %v69_v6 = vld [vmem:[#allocation3] sm:$0xf]  ;;  %vm97_vm2 = vcmask 326656  }
  0x2a   :  { %429 = vmatprep.subr.bf16.mxu1 %v565_v1  ;;  %437 = vmatprep.mubr.msk.bf16.mxu1 %vm566_vm0, %v565_v1  ;;  %v103_v3 = vsel %vm101_vm1, %v457_v2, 0  ;;  %v391_v7 = vld [vmem:[%s662_s2] ss:$0 sm:$0xff]  ;;  %vm146_vm3 = vcmask 523264   ;;  %v460_v19 = vld [vmem:[#allocation8 + $0x18] sm:$0xff]   ;;  %v461_v20 = vld [vmem:[#allocation8 + $0x10] sm:$0xff]  }
  0x2b   :  { %420 = vmatpush3.bf16.msra.mxu0 %v103_v3  ;;  %430 = vmatpush3.bf16.msra.mxu1 %v460_v19  ;;  %v462_v21 = vld [vmem:[#allocation8 + $0x8] sm:$0xff]   ;;  %v463_v23 = vld [vmem:[#allocation8] sm:$0xff]   ;;  %v567_v48 = vmov 0   ;;  %v294_v63 = vshrl.u32 %v293_v62, 7  ;;  %s568_s28 = smov [#allocation9]   ;;  %vm373_vm4 = vcmask 57344  }
  0x2c   :  { %421 = vmatprep.subr.bf16.mxu0 %v565_v1  ;;  %431 = vmatprep.subr.bf16.mxu1 %v565_v1  ;;  %v396_v28 = vld [vmem:[%s663_s3] ss:$0 sm:$0xff]  ;;  %v397_v30 = vld [vmem:[%s663_s3 + $0x1] ss:$0 sm:$0xff]  ;;  %v405_v55 = vld [vmem:[%s665_s5 + $0x2] ss:$0 sm:$0xff] }
  0x2d   :  { %v398_v35 = vld [vmem:[%s665_s5] ss:$0 sm:$0xff]  ;;  %455 = vset.pattern.permute.xlu1 %v567_v48  ;;  %456 = vset.pattern.permute.xlu0 %v567_v48  ;;  %v404_v53 = vld [vmem:[%s665_s5 + $0x1] ss:$0 sm:$0xff]  ;;  %v286_v61 = vld [vmem:[%s665_s5 + $0x3] sm:$0x1] }
  0x2e   :  { %v287_v47 = vld [vmem:[#allocation2] sm:$0x1]  ;;  %v295_v0 = vsub.s32 0, %v294_v63 }
  0x2f   :  { %422 = vmatpush3.bf16.msra.mxu0 %v458_v4  ;;  %432 = vmatpush3.bf16.msra.mxu1 %v461_v20 }
  0x30   :  { %423 = vmatprep.subr.bf16.mxu0 %v565_v1  ;;  %433 = vmatprep.subr.bf16.mxu1 %v565_v1 }
  0x33   :  { %424 = vmatpush3.bf16.msra.mxu0 %v459_v5  ;;  %434 = vmatpush3.bf16.msra.mxu1 %v462_v21 }
  0x34   :  { %441 = vmatprep.subr.mxu0 %v565_v1  ;;  %435 = vmatprep.subr.bf16.mxu1 %v565_v1 }
  0x36   :  { %426 = vmatmul.mubr.msk.bf16.vlgmr.msra.gmra.mxu0 %vm97_vm2, %v69_v6 }
  0x37   :  { %443 = vmatprep.mubr.msk.f32.mxu0 %vm566_vm0, %v565_v1  ;;  %436 = vmatpush3.bf16.msra.mxu1 %v463_v23 }
  0xf6   :  { %v139_v8 = vpop.f32.mrf.mxu0 }
  0xf7   :  { %v140_v9 = vadd.f32 %v391_v7, %v139_v8 }
  0xf8   :  { %v427_v10 = vpop.f32.mrf.mxu0 }
  0xf9   :  { %v147_v11 = vsel %vm146_vm3, %v140_v9, 0.0  ;;  %464 = vtanh.f32 %v140_v9 }
  0xfa   :  { %148 = vadd.xlane.f32.xlu0 %v147_v11  ;;  %v142_v12 = vpop.f32.mrf.mxu0 }
  0xfc   :  { %v428_v13 = vpop.f32.mrf.mxu0 }
 0x106   :  { %v465_v22 = vpop.eup %464 }
 0x183   :  { %v149_v14 = vpop.xlane.xlu0 %148 }
 0x184   :  { %v151_v15 = vmul.f32 0.015625, %v149_v14 }
 0x186   :  { %v152_v16 = vsub.f32 %v140_v9, %v151_v15 }
 0x188   :  { %v153_v17 = vmul.f32 %v152_v16, %v152_v16 }
 0x18a   :  { %v154_v18 = vsel %vm146_vm3, %v153_v17, 0.0 }
 0x18b   :  { %155 = vadd.xlane.f32.xlu0 %v154_v18 }
 0x1a1   :  { %282 = vrot.lane.b32.xlu0 %v465_v22, %s561_s29  ;;  %s381_s29 = sshll.u32 %s568_s28, 4  ;;  %s382_s29 = int_to_ptr.vmem [resolvable:$true] %s381_s29 }
 0x1a2   :  { %s534_s30 = scalar_lea.vmem %s382_s29, 16  ;;  %s538_s8 = scalar_lea.vmem %s382_s29, 32 }
 0x1a3   :  { %p535_p1 = scmp.ne.s32.totalorder %s382_s29, %s534_s30  ;;  %p539_p2 = scmp.lt.s32.totalorder %s382_s29, %s382_s29 }
 0x1a4   :  { %p540_p3 = scmp.lt.s32.totalorder %s538_s8, %s534_s30 }
 0x1a6   :  { %p541_p4 = por %p540_p3, %p539_p2 }
 0x1a8   :  { %p542_p5 = pnand %p541_p4, %p535_p1 }
 0x214   :  { %v156_v24 = vpop.xlane.xlu0 %155 }
 0x215   :  { %v157_v25 = vmul.f32 0.015625, %v156_v24 }
 0x217   :  { %v158_v26 = vadd.f32 1e-05, %v157_v25 }
 0x218   :  { %v283_v59 = vpop.permute.xlu0 %282 }
 0x219   :  { %466 = vrsqrt.f32 %v158_v26 }
 0x226   :  { %v467_v27 = vpop.eup %466 }
 0x227   :  { %v160_v29 = vmul.f32 %v467_v27, %v152_v16 }
 0x229   :  { %v166_v31 = vmul.f32 %v396_v28, %v160_v29 }
 0x22b   :  { %v172_v32 = vadd.f32 %v397_v30, %v166_v31 }
 0x22d   :  { %468 = vtanh.f32 %v172_v32 }
 0x23a   :  { %v469_v33 = vpop.eup %468 }
 0x23b   :  { %v174_v34 = vpack.c.bf16 %v469_v33, %v469_v33 }
 0x23d   :  { %438 = vmatmul.mubr.msk.bf16.vlgmr.msra.gmra.mxu1 %vm146_vm3, %v174_v34 }
 0x2fd   :  { %v249_v36 = vpop.f32.mrf.mxu1 }
 0x2fe   :  { %v250_v37 = vadd.f32 %v398_v35, %v249_v36 }
 0x2ff   :  { %v439_v38 = vpop.f32.mrf.mxu1 }
 0x300   :  { %v255_v39 = vsel %vm146_vm3, %v250_v37, 0.0 }
 0x301   :  { %256 = vadd.xlane.f32.xlu1 %v255_v39  ;;  %v252_v40 = vpop.f32.mrf.mxu1 }
 0x303   :  { %v440_v41 = vpop.f32.mrf.mxu1 }
 0x38a   :  { %v257_v42 = vpop.xlane.xlu1 %256 }
 0x38b   :  { %v258_v43 = vmul.f32 0.015625, %v257_v42 }
 0x38d   :  { %v259_v44 = vsub.f32 %v250_v37, %v258_v43 }
 0x38f   :  { %v260_v45 = vmul.f32 %v259_v44, %v259_v44 }
 0x391   :  { %v261_v46 = vsel %vm146_vm3, %v260_v45, 0.0 }
 0x392   :  { %262 = vadd.xlane.f32.xlu1 %v261_v46 }
 0x3a3   :  { %290 = vperm.xlu1 %455, %v287_v47  }
 0x41b   :  { %v263_v49 = vpop.xlane.xlu1 %262 }
 0x41c   :  { %v264_v50 = vmul.f32 0.015625, %v263_v49 }
 0x41e   :  { %v265_v51 = vadd.f32 1e-05, %v264_v50 }
 0x41f   :  { %v291_v1 = vpop.permute.xlu1 %290 }
 0x420   :  { %470 = vrsqrt.f32 %v265_v51  ;;  %v296_v2 = vrot.slane %v291_v1, %v295_v0 }
 0x42d   :  { %v471_v52 = vpop.eup %470 }
 0x42e   :  { %v267_v54 = vmul.f32 %v471_v52, %v259_v44 }
 0x430   :  { %v273_v56 = vmul.f32 %v404_v53, %v267_v54 }
 0x432   :  { %v279_v57 = vadd.f32 %v405_v55, %v273_v56 }
 0x434   :  { %472 = vtanh.f32 %v279_v57 }
 0x441   :  { %v473_v58 = vpop.eup %472 }
 0x442   :  { %v285_v60 = vadd.f32 %v473_v58, %v283_v59 }
 0x444   :  { %442 = vmatpush3.xpose.msk.msra.mxu0 %vm146_vm3, %v285_v60 }
 0x447   :  { %444 = vmatmul.mubr.msk.f32.vlgmr.msra.gmra.mxu0 %vm146_vm3, %v286_v61 }
 0x507   :  { %v369_v3 = vpop.f32.mrf.mxu0 }
 0x508   :  { %v370_v4 = vadd.f32 %v369_v3, %v296_v2 }
 0x509   :  { %v445_v5 = vpop.f32.mrf.mxu0 }
 0x50a   :  { %374 = vst.msk [vmem:[#allocation9] sm:$0x1] %vm373_vm4, %v370_v4 }
 0x50b   :  { %545 = shalt.err (!%p542_p5)
}
 0x50c   :  { %384 = dma.vmem_to_hbm [thread:$0]  %s382_s29, 16, %s667_s7, [#allocation5]  }
 0x50d   :  { %558 = dma.done.wait [#allocation5], 16  }
 0x50e   :  { %559 = vsyncadd [#allocation5], 4294967280 }
 0x50f   :  { %388 = vsyncpa [#allocation4], 1 }
 0x510   :  { %389 = vsyncpa [#allocation7], 1 }
 0x511   :  { %390 = vsyncpa [#allocation5], 1 }

</bundles_post_ra>
